<compile_context>
chip_gen: v7x
topology: tpu7x:2x2x1
jax: 0.10.0
libtpu: 0.0.40
codegen_flags: <defaults>
</compile_context>

<pallas_src>
import jax
import jax.numpy as jnp
from jax.experimental import pallas as pl
from jax.experimental.pallas import tpu as pltpu


def _linreg_threshold_kernel(theta1_ref, theta0_ref, x_ref, out_ref):
    # All refs live in SMEM; everything runs on the scalar path.
    #   theta1_ref: f32[3], theta0_ref: f32[1], x_ref: f32[3], out_ref: f32[1]
    pred = (theta1_ref[0] * x_ref[0]
            + theta1_ref[1] * x_ref[1]
            + theta1_ref[2] * x_ref[2]
            + theta0_ref[0])
    # Strict > 0 (matches the PyTorch `if prediction > 0`); single scalar store.
    out_ref[0] = (pred > jnp.float32(0.0)).astype(out_ref.dtype)


@jax.jit
def linear_regression_model_forward(theta1, theta0, x):
    """theta1: (3,) f32, theta0: (1,) f32, x: (3,) f32 -> (1,) f32 in {0., 1.}"""
    # Trace-time shape guards (prevents silent misindexing of the hard-coded dot).
    assert theta1.shape == (3,), f"theta1 must be (3,), got {theta1.shape}"
    assert theta0.shape == (1,), f"theta0 must be (1,), got {theta0.shape}"
    assert x.shape == (3,), f"x must be (3,), got {x.shape}"

    smem = pl.BlockSpec(memory_space=pltpu.MemorySpace.SMEM)
    out = pl.pallas_call(
        _linreg_threshold_kernel,
        out_shape=jax.ShapeDtypeStruct((1,), jnp.float32),
        in_specs=[smem, smem, smem],
        out_specs=smem,
    )(theta1.astype(jnp.float32),
      theta0.astype(jnp.float32),
      x.astype(jnp.float32))
    return out


if __name__ == "__main__":
    # Deterministic parameter init, matching the module's __init__ (zeros).
    theta1 = jnp.zeros((3,), dtype=jnp.float32)
    theta0 = jnp.zeros((1,), dtype=jnp.float32)

    # Small deterministic input consistent with theta1.dot(x): x has shape (3,).
    key = jax.random.PRNGKey(0)
    kx, kt1, kt0 = jax.random.split(key, 3)
    x = jax.random.normal(kx, (3,), dtype=jnp.float32)

    def ref(t1, t0, xv):
        pred = jnp.dot(t1, xv).reshape(1) + t0
        return jnp.where(pred > 0, jnp.ones(1), jnp.zeros(1)).astype(jnp.float32)

    # Case 1: zero parameters (the module's actual init) -> pred == 0 -> output 0.
    out0 = jax.block_until_ready(linear_regression_model_forward(theta1, theta0, x))
    assert out0.shape == (1,)
    assert bool(jnp.all(out0 == ref(theta1, theta0, x)))

    # Case 2: random parameters, to exercise both sides of the threshold.
    t1r = jax.random.normal(kt1, (3,), dtype=jnp.float32)
    t0r = jax.random.normal(kt0, (1,), dtype=jnp.float32)
    out1 = jax.block_until_ready(linear_regression_model_forward(t1r, t0r, x))
    assert out1.shape == (1,)
    assert bool(jnp.all(out1 == ref(t1r, t0r, x)))

    # Case 3: flip the sign to make sure the other branch of the threshold fires.
    out2 = jax.block_until_ready(linear_regression_model_forward(-t1r, -t0r, x))
    assert out2.shape == (1,)
    assert bool(jnp.all(out2 == ref(-t1r, -t0r, x)))

    print("KERNEL_OK")
</pallas_src>

<mosaic_0001>
module attributes {stable_mosaic.version = 11 : i64} {
  func.func @_linreg_threshold_kernel(%arg0: memref<3xf32, #tpu.memory_space<smem>>, %arg1: memref<1xf32, #tpu.memory_space<smem>>, %arg2: memref<3xf32, #tpu.memory_space<smem>>, %arg3: memref<1xf32, #tpu.memory_space<smem>>) attributes {dimension_semantics = [], scalar_prefetch = 0 : i64, scratch_operands = 0 : i64, tpu.core_type = #tpu.core_type<tc>} {
    %c0 = arith.constant 0 : index
    %0 = memref.load %arg0[%c0] : memref<3xf32, #tpu.memory_space<smem>>
    %c0_0 = arith.constant 0 : index
    %1 = memref.load %arg2[%c0_0] : memref<3xf32, #tpu.memory_space<smem>>
    %2 = arith.mulf %0, %1 : f32
    %c1 = arith.constant 1 : index
    %3 = memref.load %arg0[%c1] : memref<3xf32, #tpu.memory_space<smem>>
    %c1_1 = arith.constant 1 : index
    %4 = memref.load %arg2[%c1_1] : memref<3xf32, #tpu.memory_space<smem>>
    %5 = arith.mulf %3, %4 : f32
    %6 = arith.addf %2, %5 : f32
    %c2 = arith.constant 2 : index
    %7 = memref.load %arg0[%c2] : memref<3xf32, #tpu.memory_space<smem>>
    %c2_2 = arith.constant 2 : index
    %8 = memref.load %arg2[%c2_2] : memref<3xf32, #tpu.memory_space<smem>>
    %9 = arith.mulf %7, %8 : f32
    %10 = arith.addf %6, %9 : f32
    %c0_3 = arith.constant 0 : index
    %11 = memref.load %arg1[%c0_3] : memref<1xf32, #tpu.memory_space<smem>>
    %12 = arith.addf %10, %11 : f32
    %cst = arith.constant 0.000000e+00 : f32
    %13 = arith.cmpf ogt, %12, %cst : f32
    %14 = arith.extui %13 : i1 to i32
    %15 = arith.sitofp %14 : i32 to f32
    %c0_4 = arith.constant 0 : index
    %16 = memref.load %arg3[%c0_4] : memref<1xf32, #tpu.memory_space<smem>>
    memref.store %15, %arg3[%c0_4] : memref<1xf32, #tpu.memory_space<smem>>
    return
  }
}

</mosaic_0001>

<bundles_post_ra>
// kernel: linear_regression_model_forward.1
= control target key start
LH: loop header
LB: loop body
LE: loop exit
PB: predicated region body
PF: predicated region fallthrough
CT: control target
= control target key end

     0   :  { %9 = vsyncpa [#allocation5], 0  ;;  %s165_s0 = inlined_call_operand.vmem [shape: f32[3], index: 0, kind: input, shape index: {}]   ;;  %s166_s1 = inlined_call_operand.<no memory space> [shape: f32[1], index: 1, kind: input, shape index: {}]   ;;  %s167_s2 = inlined_call_operand.vmem [shape: f32[3], index: 2, kind: input, shape index: {}]   ;;  %s168_s3 = inlined_call_operand.hbm [shape: f32[1], index: 3, kind: output, shape index: {}]  }
   0x1   :  { %10 = vsyncpa [#allocation7], 0 }
   0x2   :  { %11 = vsyncpa [#allocation4], 0  ;;  %s18_s14 = sshll.u32 %s165_s0, 4  ;;  %s30_s17 = sshll.u32 %s167_s2, 4  ;;  %s19_s14 = int_to_ptr.vmem [resolvable:$true] %s18_s14  ;;  %s31_s17 = int_to_ptr.vmem [resolvable:$true] %s30_s17 }
   0x3   :  { %s81_s18 = scalar_lea.vmem %s19_s14, 16  ;;  %p86_p1 = scmp.lt.s32.totalorder %s19_s14, %s19_s14 }
   0x4   :  { %p82_p0 = scmp.ne.s32.totalorder %s19_s14, %s81_s18  ;;  %p87_p2 = scmp.lt.s32.totalorder %s81_s18, %s81_s18 }
   0x6   :  { %p88_p3 = por %p87_p2, %p86_p1 }
   0x8   :  { %p89_p4 = pnand %p88_p3, %p82_p0 }
   0xa   :  { %92 = shalt.err (!%p89_p4)
}
   0xb   :  { %s121_s19 = smov [#allocation3]   ;;  %s93_s20 = scalar_lea.vmem %s31_s17, 16 }
   0xc   :  { %21 = dma.vmem_to_smem %s19_s14, 16, %s121_s19, [#allocation5]  }
   0xd   :  { %p94_p5 = scmp.ne.s32.totalorder %s31_s17, %s93_s20  ;;  %p98_p6 = scmp.lt.s32.totalorder %s31_s17, %s31_s17 }
   0xe   :  { %p99_p7 = scmp.lt.s32.totalorder %s93_s20, %s93_s20 }
  0x10   :  { %p100_p8 = por %p99_p7, %p98_p6 }
  0x12   :  { %p101_p9 = pnand %p100_p8, %p94_p5 }
  0x14   :  { %104 = shalt.err (!%p101_p9)
}
  0x15   :  { %s122_s0 = smov [#allocation6]  }
  0x16   :  { %33 = dma.vmem_to_smem %s31_s17, 16, %s122_s0, [#allocation7]  }
  0x17   :  { %115 = dma.done.wait [#allocation5], 16  }
  0x18   :  { %116 = vsyncadd [#allocation5], 4294967280 }
  0x19   :  { %117 = dma.done.wait [#allocation7], 16  }
  0x1a   :  { %118 = vsyncadd [#allocation7], 4294967280 }
  0x1b   :  { %40 = sfence }
  0x1c   :  { %s41_s2 = sld [smem:[#allocation3]]  ;;  %s74_s22 = sld [smem:[#allocation3 + $0x1]] }
  0x1d   :  { %s42_s21 = sld [smem:[#allocation6]]  ;;  %s75_s23 = sld [smem:[#allocation6 + $0x1]] }
  0x1e   :  { %s76_s24 = sld [smem:[#allocation3 + $0x2]]  ;;  %s105_s11 = scalar_lea.hbm %s168_s3, 16 }
  0x1f   :  { %s77_s25 = sld [smem:[#allocation6 + $0x2]]  ;;  %p106_p11 = scmp.ne.s32.totalorder %s168_s3, %s105_s11 }
  0x20   :  { %p109_p12 = scmp.lt.u32.totalorder %s105_s11, %s168_s3 }
  0x22   :  { %p111_p13 = pnand %p109_p12, %p106_p11 }
  0x23   :  { %s43_s26 = smul.f32 %s42_s21, %s41_s2 }
  0x24   :  { %s46_s27 = smul.f32 %s75_s23, %s74_s22 }
  0x25   :  { %s50_s28 = smul.f32 %s77_s25, %s76_s24 }
  0x26   :  { %s47_s29 = sadd.f32 %s46_s27, %s43_s26 }
  0x28   :  { %s51_s30 = sadd.f32 %s50_s28, %s47_s29 }
  0x2a   :  { %s53_s6 = sadd.f32 %s51_s30, %s166_s1 }
  0x2c   :  { %p54_p10 = scmp.gt.f32.partialorder %s53_s6, 0.0 }
  0x2e   :  { %s55_s7 = scalar_select %p54_p10, 1, 0 }
  0x30   :  { %s56_s8 = scvt.s32.f32 %s55_s7 }
  0x32   :  { %58 = sst [smem:[#allocation8]] %s56_s8 }
  0x33   :  { %114 = shalt.err (!%p111_p13)
}
  0x34   :  { %s123_s16 = smov [#allocation8]  }
  0x35   :  { %66 = dma.smem_to_hbm %s123_s16, 16, %s168_s3, [#allocation4]  }
  0x36   :  { %119 = dma.done.wait [#allocation4], 16  }
  0x37   :  { %120 = vsyncadd [#allocation4], 4294967280 }
  0x38   :  { %70 = sfence }
  0x39   :  { %71 = vsyncpa [#allocation4], 1 }
  0x3a   :  { %72 = vsyncpa [#allocation5], 1 }
  0x3b   :  { %73 = vsyncpa [#allocation7], 1 }

</bundles_post_ra>
